<compile_context>
chip_gen: v7x
topology: tpu7x:2x2x1
jax: 0.10.0
libtpu: 0.0.40
codegen_flags: <defaults>
</compile_context>

<pallas_src>
import jax
import jax.numpy as jnp
from jax.experimental import pallas as pl
from jax.experimental.pallas import tpu as pltpu


def _round_up(a, b):
    return ((a + b - 1) // b) * b


def _fast_gelu(x):
    # Ascend fast_gelu(x) == x * sigmoid(1.702 * x).
    # Single EUP exp + approx EUP reciprocal; keeps the VALU slot free.
    return x * pl.reciprocal(1.0 + jnp.exp(-1.702 * x), approx=True)


def mlp_kernel(x_ref, w1_ref, b1_ref, w2_ref, b2_ref, o_ref, acc_ref):
    # x_ref: (tm, D_in); w1_ref: (D_in, th); b1_ref: (1, th)
    # w2_ref: (th, D_out); b2_ref: (1, D_out); o_ref: (tm, D_out)
    # acc_ref: (tm, D_out) f32 accumulator across the hidden-chunk grid axis.
    j = pl.program_id(1)

    @pl.when(j == 0)
    def _():
        acc_ref[...] = jnp.zeros_like(acc_ref)

    h = jnp.dot(x_ref[...], w1_ref[...], preferred_element_type=jnp.float32)
    h = h + b1_ref[...].astype(jnp.float32)
    h = _fast_gelu(h)
    # Dropout(p=0.0) -> identity.
    # Feed fc2 in the weights' native dtype (bf16 stays bf16, f32 stays f32).
    acc_ref[...] += jnp.dot(h.astype(w2_ref.dtype), w2_ref[...],
                            preferred_element_type=jnp.float32)

    @pl.when(j == pl.num_programs(1) - 1)
    def _():
        # Dropout(p=0.0) -> identity.
        o_ref[...] = (acc_ref[...] + b2_ref[...].astype(jnp.float32)).astype(o_ref.dtype)


def prepare_mlp_params(w1, b1, w2, b2):
    """One-time conversion from nn.Linear layout (out, in) to (in, out).

    Call this at parameter-init time so the per-call hot path pays no HBM
    transpose.
    """
    return w1.T, b1.reshape(1, -1), w2.T, b2.reshape(1, -1)


def _vmem_capacity_bytes():
    try:
        return int(pltpu.get_tpu_info().vmem_capacity_bytes)
    except Exception:
        return 64 * 1024 * 1024  # conservative (v7x-sized) fallback


def _pick_hidden_chunk(H, D_in, D_out, tm, itemsize, budget):
    """Pick the hidden-dim chunk th and return (th, estimated resident VMEM)."""

    def resident(th, single_buffered):
        nbuf = 1 if single_buffered else 2
        w = nbuf * (D_in * th + th + th * D_out) * itemsize + D_out * itemsize
        act = 2 * tm * (D_in + D_out) * itemsize           # x / out row tiles
        inter = tm * th * 4 + tm * th * itemsize           # f32 h + cast copy
        inter += 2 * tm * D_out * 4                        # acc scratch + y tile
        return w + act + inter

    if resident(H, True) <= 0.5 * budget:
        return H, resident(H, True)
    for th in (1024, 512, 256, 128):
        # Chunking a reduction axis is only safe when th divides H exactly
        # (a ragged chunk would accumulate garbage hidden columns).
        if H % th == 0 and resident(th, False) <= 0.7 * budget:
            return th, resident(th, False)
    # TODO(synk): pad H once at param-init time if no clean divisor fits VMEM.
    return H, resident(H, True)


def mlp_pallas(x, w1t, b1r, w2t, b2r, *, tile_m=None):
    """DINO Mlp forward.  x: (B, N, D_in).

    Parameters must come from prepare_mlp_params():
      w1t: (D_in, H), b1r: (1, H), w2t: (H, D_out), b2r: (1, D_out).
    """
    B, N, D_in = x.shape
    H = w1t.shape[1]
    D_out = w2t.shape[1]
    M = B * N
    itemsize = jnp.dtype(x.dtype).itemsize

    vmem_cap = _vmem_capacity_bytes()
    budget = int(0.85 * vmem_cap)

    # MXU-sized row tile: 512 when VMEM is roomy (v5e/v6e: 128 MiB) and there
    # are enough rows; else 256.  Clamped for tiny inputs.
    if tile_m is None:
        tile_m = 512 if (vmem_cap >= 96 * 1024 * 1024 and M >= 512) else 256
    tm = max(8, min(_round_up(tile_m, 8), _round_up(M, 8)))
    # Give both v7x TensorCores work even for small M (>= 2 row blocks).
    if pl.cdiv(M, tm) < 2 and M > 8:
        tm = _round_up(pl.cdiv(M, 2), 8)
    grid_m = pl.cdiv(M, tm)

    th, vmem_needed = _pick_hidden_chunk(H, D_in, D_out, tm, itemsize, budget)
    n_h = pl.cdiv(H, th)

    x2 = x.reshape(M, D_in)      # metadata-only view; no padding

    inv = pl.Buffered(1)         # grid-invariant operands: single-buffer
    if n_h == 1:
        w1_spec = pl.BlockSpec((D_in, th), lambda i, j: (0, 0), pipeline_mode=inv)
        b1_spec = pl.BlockSpec((1, th), lambda i, j: (0, 0), pipeline_mode=inv)
        w2_spec = pl.BlockSpec((th, D_out), lambda i, j: (0, 0), pipeline_mode=inv)
    else:
        w1_spec = pl.BlockSpec((D_in, th), lambda i, j: (0, j))
        b1_spec = pl.BlockSpec((1, th), lambda i, j: (0, j))
        w2_spec = pl.BlockSpec((th, D_out), lambda i, j: (j, 0))
    b2_spec = pl.BlockSpec((1, D_out), lambda i, j: (0, 0), pipeline_mode=inv)

    param_bytes = (D_in * H + H * D_out + H + D_out) * itemsize
    cost = pl.CostEstimate(
        flops=2 * M * (D_in * H + H * D_out),
        transcendentals=2 * M * H,          # exp + reciprocal per hidden elem
        bytes_accessed=M * (D_in + D_out) * itemsize + param_bytes,
    )

    vmem_limit = int(min(budget, max(32 * 1024 * 1024, vmem_needed + (8 << 20))))

    out2 = pl.pallas_call(
        mlp_kernel,
        out_shape=jax.ShapeDtypeStruct((M, D_out), x.dtype),
        grid_spec=pltpu.PrefetchScalarGridSpec(
            num_scalar_prefetch=0,
            grid=(grid_m, n_h),
            in_specs=[
                pl.BlockSpec((tm, D_in), lambda i, j: (i, 0)),
                w1_spec, b1_spec, w2_spec, b2_spec,
            ],
            out_specs=pl.BlockSpec((tm, D_out), lambda i, j: (i, 0)),
            scratch_shapes=[pltpu.VMEM((tm, D_out), jnp.float32)],
        ),
        compiler_params=pltpu.CompilerParams(
            dimension_semantics=("parallel", "arbitrary"),
            vmem_limit_bytes=vmem_limit,
        ),
        cost_estimate=cost,
    )(x2, w1t, b1r, w2t, b2r)

    return out2.reshape(B, N, D_out)


def mlp_reference(x, w1, b1, w2, b2):
    # Independent reference: literal Ascend fast_gelu formula
    # x * exp(0.851*(x - |x|)) / (1 + exp(-1.702*|x|)), nn.Linear layout weights.
    xf = x.astype(jnp.float32)
    h = jnp.einsum("bnd,hd->bnh", xf, w1.astype(jnp.float32)) + b1.astype(jnp.float32)
    ah = jnp.abs(h)
    h = h * jnp.exp(0.851 * (h - ah)) / (1.0 + jnp.exp(-1.702 * ah))
    y = jnp.einsum("bnh,oh->bno", h, w2.astype(jnp.float32)) + b2.astype(jnp.float32)
    return y.astype(x.dtype)


if __name__ == "__main__":
    # Small shapes consistent with a ViT MLP block.
    B, N = 2, 8
    in_features = 32
    hidden_features = 64
    out_features = in_features  # default: out_features = in_features

    key = jax.random.PRNGKey(0)
    kx, kw1, kb1, kw2, kb2 = jax.random.split(key, 5)

    x = jax.random.normal(kx, (B, N, in_features), dtype=jnp.float32)

    # nn.Linear shapes: weight (out, in), bias (out,)
    w1 = 0.05 * jax.random.normal(kw1, (hidden_features, in_features), dtype=jnp.float32)
    b1 = 0.01 * jax.random.normal(kb1, (hidden_features,), dtype=jnp.float32)
    w2 = 0.05 * jax.random.normal(kw2, (out_features, hidden_features), dtype=jnp.float32)
    b2 = 0.01 * jax.random.normal(kb2, (out_features,), dtype=jnp.float32)

    # One-time parameter prep (outside the per-call hot path).
    w1t, b1r, w2t, b2r = prepare_mlp_params(w1, b1, w2, b2)

    out = mlp_pallas(x, w1t, b1r, w2t, b2r)
    out = jax.block_until_ready(out)

    ref = mlp_reference(x, w1, b1, w2, b2)
    assert out.shape == (B, N, out_features)
    # approx=True reciprocal -> slightly looser tolerance than the exact ref.
    assert jnp.allclose(out, ref, atol=2e-3, rtol=2e-3), "mismatch vs reference"

    print("KERNEL_OK")
</pallas_src>

<mosaic_0001>
module attributes {stable_mosaic.version = 11 : i64} {
  func.func @mlp_kernel(%arg0: i32, %arg1: i32, %arg2: memref<8x32xf32, #tpu.memory_space<vmem>>, %arg3: memref<32x64xf32, #tpu.memory_space<vmem>>, %arg4: memref<1x64xf32, #tpu.memory_space<vmem>>, %arg5: memref<64x32xf32, #tpu.memory_space<vmem>>, %arg6: memref<1x32xf32, #tpu.memory_space<vmem>>, %arg7: memref<8x32xf32, #tpu.memory_space<vmem>>, %arg8: memref<8x32xf32, #tpu.memory_space<vmem>>) attributes {dimension_semantics = [#tpu.dimension_semantics<parallel>, #tpu.dimension_semantics<arbitrary>], iteration_bounds = array<i64: 2, 1>, scalar_prefetch = 0 : i64, scratch_operands = 1 : i64, tpu.core_type = #tpu.core_type<tc>, window_params = [{transform_indices = @transform_0, window_bounds = array<i64: 8, 32>}, {pipeline_mode = #tpu.pipeline_mode<synchronous>, transform_indices = @transform_1, window_bounds = array<i64: 32, 64>}, {pipeline_mode = #tpu.pipeline_mode<synchronous>, transform_indices = @transform_2, window_bounds = array<i64: 1, 64>}, {pipeline_mode = #tpu.pipeline_mode<synchronous>, transform_indices = @transform_3, window_bounds = array<i64: 64, 32>}, {pipeline_mode = #tpu.pipeline_mode<synchronous>, transform_indices = @transform_4, window_bounds = array<i64: 1, 32>}, {transform_indices = @transform_5, window_bounds = array<i64: 8, 32>}]} {
    %c0_i32 = arith.constant 0 : i32
    %0 = arith.cmpi eq, %arg1, %c0_i32 : i32
    %1 = arith.extui %0 : i1 to i32
    %c0_i32_0 = arith.constant 0 : i32
    %2 = arith.cmpi ne, %1, %c0_i32_0 : i32
    scf.if %2 {
      %cst_17 = arith.constant 0.000000e+00 : f32
      %24 = vector.broadcast %cst_17 : f32 to vector<8x32xf32>
      %c0_18 = arith.constant 0 : index
      %c0_19 = arith.constant 0 : index
      %25 = vector.load %arg8[%c0_18, %c0_19] : memref<8x32xf32, #tpu.memory_space<vmem>>, vector<8x32xf32>
      tpu.vector_store %arg8[%c0_18, %c0_19], %24 {strides = array<i32>} : memref<8x32xf32, #tpu.memory_space<vmem>>, vector<8x32xf32>,
    } else {
    }
    %c0 = arith.constant 0 : index
    %c0_1 = arith.constant 0 : index
    %3 = vector.load %arg2[%c0, %c0_1] : memref<8x32xf32, #tpu.memory_space<vmem>>, vector<8x32xf32>
    %c0_2 = arith.constant 0 : index
    %c0_3 = arith.constant 0 : index
    %4 = vector.load %arg3[%c0_2, %c0_3] : memref<32x64xf32, #tpu.memory_space<vmem>>, vector<32x64xf32>
    %cst = arith.constant dense<0.000000e+00> : vector<8x64xf32>
    %5 = tpu.matmul %3, %4, %cst {dimension_numbers = #tpu.dot_dimension_numbers<[1], [0], [0], [1], [0, 0, 1, 1], [], []>} : vector<8x32xf32>, vector<32x64xf32>, vector<8x64xf32> -> vector<8x64xf32>
    %c0_4 = arith.constant 0 : index
    %c0_5 = arith.constant 0 : index
    %6 = vector.load %arg4[%c0_4, %c0_5] : memref<1x64xf32, #tpu.memory_space<vmem>>, vector<1x64xf32>
    %7 = vector.broadcast %6 : vector<1x64xf32> to vector<8x64xf32>
    %8 = arith.addf %5, %7 : vector<8x64xf32>
    %cst_6 = arith.constant -1.702000e+00 : f32
    %9 = vector.broadcast %cst_6 : f32 to vector<8x64xf32>
    %10 = arith.mulf %9, %8 : vector<8x64xf32>
    %11 = math.exp %10 : vector<8x64xf32>
    %cst_7 = arith.constant 1.000000e+00 : f32
    %12 = vector.broadcast %cst_7 : f32 to vector<8x64xf32>
    %13 = arith.addf %12, %11 : vector<8x64xf32>
    %14 = tpu.reciprocal %13 {approx = true} : vector<8x64xf32> -> vector<8x64xf32>
    %15 = arith.mulf %8, %14 : vector<8x64xf32>
    %c0_8 = arith.constant 0 : index
    %c0_9 = arith.constant 0 : index
    %16 = vector.load %arg8[%c0_8, %c0_9] : memref<8x32xf32, #tpu.memory_space<vmem>>, vector<8x32xf32>
    %c0_10 = arith.constant 0 : index
    %c0_11 = arith.constant 0 : index
    %17 = vector.load %arg5[%c0_10, %c0_11] : memref<64x32xf32, #tpu.memory_space<vmem>>, vector<64x32xf32>
    %cst_12 = arith.constant dense<0.000000e+00> : vector<8x32xf32>
    %18 = tpu.matmul %15, %17, %cst_12 {dimension_numbers = #tpu.dot_dimension_numbers<[1], [0], [0], [1], [0, 0, 1, 1], [], []>} : vector<8x64xf32>, vector<64x32xf32>, vector<8x32xf32> -> vector<8x32xf32>
    %19 = arith.addf %16, %18 : vector<8x32xf32>
    %c0_13 = arith.constant 0 : index
    %c0_14 = arith.constant 0 : index
    %20 = vector.load %arg8[%c0_13, %c0_14] : memref<8x32xf32, #tpu.memory_space<vmem>>, vector<8x32xf32>
    tpu.vector_store %arg8[%c0_13, %c0_14], %19 {strides = array<i32>} : memref<8x32xf32, #tpu.memory_space<vmem>>, vector<8x32xf32>,
    %c0_i32_15 = arith.constant 0 : i32
    %21 = arith.cmpi eq, %arg1, %c0_i32_15 : i32
    %22 = arith.extui %21 : i1 to i32
    %c0_i32_16 = arith.constant 0 : i32
    %23 = arith.cmpi ne, %22, %c0_i32_16 : i32
    scf.if %23 {
      %c0_17 = arith.constant 0 : index
      %c0_18 = arith.constant 0 : index
      %24 = vector.load %arg8[%c0_17, %c0_18] : memref<8x32xf32, #tpu.memory_space<vmem>>, vector<8x32xf32>
      %c0_19 = arith.constant 0 : index
      %c0_20 = arith.constant 0 : index
      %25 = vector.load %arg6[%c0_19, %c0_20] : memref<1x32xf32, #tpu.memory_space<vmem>>, vector<1x32xf32>
      %26 = vector.broadcast %25 : vector<1x32xf32> to vector<8x32xf32>
      %27 = arith.addf %24, %26 : vector<8x32xf32>
      %c0_21 = arith.constant 0 : index
      %c0_22 = arith.constant 0 : index
      %28 = vector.load %arg7[%c0_21, %c0_22] : memref<8x32xf32, #tpu.memory_space<vmem>>, vector<8x32xf32>
      tpu.vector_store %arg7[%c0_21, %c0_22], %27 {strides = array<i32>} : memref<8x32xf32, #tpu.memory_space<vmem>>, vector<8x32xf32>,
    } else {
    }
    return
  }
  func.func @transform_0(%arg0: i32, %arg1: i32) -> (i32, i32) {
    %c0_i32 = arith.constant 0 : i32
    %c0_i32_0 = arith.constant 0 : i32
    return %arg0, %c0_i32 : i32, i32
  }
  func.func @transform_1(%arg0: i32, %arg1: i32) -> (i32, i32) {
    %c0_i32 = arith.constant 0 : i32
    %c0_i32_0 = arith.constant 0 : i32
    %c0_i32_1 = arith.constant 0 : i32
    return %c0_i32, %c0_i32_0 : i32, i32
  }
  func.func @transform_2(%arg0: i32, %arg1: i32) -> (i32, i32) {
    %c0_i32 = arith.constant 0 : i32
    %c0_i32_0 = arith.constant 0 : i32
    %c0_i32_1 = arith.constant 0 : i32
    return %c0_i32, %c0_i32_0 : i32, i32
  }
  func.func @transform_3(%arg0: i32, %arg1: i32) -> (i32, i32) {
    %c0_i32 = arith.constant 0 : i32
    %c0_i32_0 = arith.constant 0 : i32
    %c0_i32_1 = arith.constant 0 : i32
    return %c0_i32, %c0_i32_0 : i32, i32
  }
  func.func @transform_4(%arg0: i32, %arg1: i32) -> (i32, i32) {
    %c0_i32 = arith.constant 0 : i32
    %c0_i32_0 = arith.constant 0 : i32
    %c0_i32_1 = arith.constant 0 : i32
    return %c0_i32, %c0_i32_0 : i32, i32
  }
  func.func @transform_5(%arg0: i32, %arg1: i32) -> (i32, i32) {
    %c0_i32 = arith.constant 0 : i32
    %c0_i32_0 = arith.constant 0 : i32
    return %arg0, %c0_i32 : i32, i32
  }
}

</mosaic_0001>

<bundles_post_ra>
// kernel: tpu_custom_call.1
= control target key start
LH: loop header
LB: loop body
LE: loop exit
PB: predicated region body
PF: predicated region fallthrough
CT: control target
= control target key end

     0   :  { %10 = vsyncpa [#allocation4], 0  ;;  %s920_s0 = inlined_call_operand.vmem [shape: f32[16,32], index: 0, kind: input, shape index: {}]   ;;  %s921_s1 = inlined_call_operand.vmem [shape: f32[32,64], index: 1, kind: input, shape index: {}]   ;;  %s922_s2 = inlined_call_operand.vmem [shape: f32[1,64], index: 2, kind: input, shape index: {}]   ;;  %s923_s3 = inlined_call_operand.vmem [shape: f32[64,32], index: 3, kind: input, shape index: {}]   ;;  %s924_s4 = inlined_call_operand.vmem [shape: f32[1,32], index: 4, kind: input, shape index: {}]   ;;  %s925_s5 = inlined_call_operand.hbm [shape: f32[16,32], index: 5, kind: output, shape index: {}]  }
   0x1   :  { %12 = vsyncpa [#allocation4 + $0x1], 0  ;;  %s762_s18 = smov 0   ;;  %s764_s19 = smov 0  }
   0x2   :  { %s766_s20 = smov 0   ;;  %s768_s21 = smov 0  }
   0x3   :  { %s770_s22 = smov 0   ;;  %s772_s23 = smov 0  }
   0x4 LB: > { %s509_s24 = sadd.s32 4294967295, %s726_s23   ;;  %s510_s25 = sadd.s32 4294967294, %s726_s23   ;;  %s726_s23 = sphi %s772_s23, %s18_s23   ;;  %s722_s22 = sphi %s770_s22, %s932_s22   ;;  %s718_s21 = sphi %s768_s21, %s931_s21   ;;  %s714_s20 = sphi %s766_s20, %s930_s20   ;;  %s710_s19 = sphi %s764_s19, %s929_s19   ;;  %s706_s18 = sphi %s762_s18, %s928_s18  }
   0x5   : > { %s30_s26 = sadd.s32 1, %s722_s22  ;;  %s147_s27 = sadd.s32 1, %s714_s20 }
   0x6   : > { %p32_p0 = scmp.ge.s32.totalorder %s30_s26, 2  ;;  %p157_p1 = scmp.ne.s32.totalorder %s714_s20, %s710_s19 }
   0x7   : > { %p158_p2 = scmp.eq.s32.totalorder %s509_s24, 1  ;;  %p163_p3 = scmp.ne.s32.totalorder %s710_s19, %s706_s18 }
   0x8   : > { %s934_s26 = smov (%p32_p0, %s30_s26), 0  ;;  %p164_p5 = scmp.eq.s32.totalorder %s510_s25, 1 }
   0x9   : > { %p802_p4 = por %p158_p2, %p157_p1  ;;  %s144_s29 = ssub.s32 %s722_s22, %s934_s26 }
   0xa   : > { %p513_p6 = scmp.ge.s32.totalorder %s726_s23, 1  ;;  %p145_p7 = scmp.eq.s32.totalorder %s144_s29, 0 }
   0xb   : > { %p809_p8 = por %p164_p5, %p163_p3  ;;  %p201_p9 = scmp.lt.s32.totalorder %s726_s23, 3 }
   0xc   : > { %s815_s6 = scalar_select %p145_p7, %s714_s20, %s147_s27  }
   0xd   : > { %p202_p10 = pnand %p513_p6, %p201_p9 }
   0xe   : > { %v239_v0 = vld [vmem:[%s921_s1] sm:$0xff] (!%p202_p10)  ;;  %v240_v1 = vld [vmem:[%s921_s1 + $0x8] sm:$0xff] (!%p202_p10)  ;;  %v241_v2 = vld [vmem:[%s921_s1 + $0x10] sm:$0xff] (!%p202_p10)  ;;  %v728_v3 = vmov (!%p202_p10), 0.0|0.0   ;;  %vm729_vm0 = vmmov (!%p202_p10), 0   ;;  %v730_v6 = vmov (!%p202_p10), 0.0  }
   0xf   : > { %205 = sbr.rel (%p202_p10) target bundleno = 509 (0x1fd), region = 40  ;;  %568 = vmatprep.subr.bf16.mxu0 (!%p202_p10), %v728_v3  ;;  %v569_v4 = vpack.c.bf16 (!%p202_p10), %v240_v1, %v239_v0  ;;  %v242_v5 = vld [vmem:[%s921_s1 + $0x18] sm:$0xff] (!%p202_p10)  ;;  %546 = vmatprep.mubr.msk.f32.mxu0 (!%p202_p10), %vm729_vm0, %v730_v6  ;;  %p228_p11 = scmp.lt.s32.totalorder (!%p202_p10), %s718_s21, 1  ;;  %vm236_vm1 = vcmask (!%p202_p10), 261120   ;;  %v331_v9 = vld [vmem:[%s923_s3] sm:$0xff] (!%p202_p10)  ;;  %v332_v10 = vld [vmem:[%s923_s3 + $0x8] sm:$0xff] (!%p202_p10) }
  0x10   : > { %237 = vst.msk [vmem:[#allocation2] sm:$0xff] (!%p202_p10), %vm236_vm1, %v730_v6  ;;  %574 = vmatprep.subr.bf16.mxu1 (!%p202_p10), %v728_v3  ;;  %565 = vmatprep.mubr.msk.f32.mxu1 (!%p202_p10), %vm729_vm0, %v730_v6  ;;  %v572_v7 = vpack.c.bf16 (!%p202_p10), %v242_v5, %v241_v2  ;;  %v575_v11 = vpack.c.bf16 (!%p202_p10), %v332_v10, %v331_v9  ;;  %v333_v12 = vld [vmem:[%s923_s3 + $0x10] sm:$0xff] (!%p202_p10)  ;;  %v334_v13 = vld [vmem:[%s923_s3 + $0x18] sm:$0xff] (!%p202_p10)  ;;  %v335_v15 = vld [vmem:[%s923_s3 + $0x20] sm:$0xff] (!%p202_p10)  ;;  %vm339_vm2 = vcmask (!%p202_p10), 523264   ;;  %s225_s8 = sand.u32 (!%p202_p10), 1, %s710_s19  }
  0x11   : > { %570 = vmatpush3.bf16.msra.mxu0 (!%p202_p10), %v569_v4  ;;  %v578_v14 = vpack.c.bf16 (!%p202_p10), %v334_v13, %v333_v12  ;;  %v336_v16 = vld [vmem:[%s923_s3 + $0x28] sm:$0xff] (!%p202_p10)  ;;  %v337_v18 = vld [vmem:[%s923_s3 + $0x30] sm:$0xff] (!%p202_p10)  ;;  %v338_v19 = vld [vmem:[%s923_s3 + $0x38] sm:$0xff] (!%p202_p10)  ;;  %s514_s9 = sshll.u32 (!%p202_p10), %s225_s8, 3  ;;  %s521_s12 = sshll.u32 (!%p202_p10), %s718_s21, 7 }
  0x12   : > { %571 = vmatprep.subr.bf16.mxu0 (!%p202_p10), %v728_v3  ;;  %576 = vmatpush3.bf16.msra.mxu1 (!%p202_p10), %v575_v11  ;;  %v581_v17 = vpack.c.bf16 (!%p202_p10), %v336_v16, %v335_v15  ;;  %v584_v20 = vpack.c.bf16 (!%p202_p10), %v338_v19, %v337_v18  ;;  %v516_v21 = vld [vmem:[%s922_s2] ss:$0 sm:$0xff] (!%p202_p10)  ;;  %s227_s13 = scalar_lea.vmem (!%p202_p10), [#allocation3], %s514_s9  ;;  %s872_s17 = scalar_lea.hbm (!%p202_p10), %s925_s5, %s521_s12 }
  0x13   : > { %577 = vmatprep.subr.bf16.mxu1 (!%p202_p10), %v728_v3  ;;  %v519_v35 = vld [vmem:[%s924_s4] ss:$0 sm:$0xff] (!%p202_p10)  ;;  %s442_s14 = sshll.u32 (!%p202_p10), %s227_s13, 4  ;;  %s429_s24 = scalar_lea.sflag (!%p202_p10), [#allocation4], %s225_s8  ;;  %s874_s14 = int_to_ptr.vmem [resolvable:$true] %s442_s14 }
  0x15   : > { %573 = vmatpush3.bf16.msra.mxu0 (!%p202_p10), %v572_v7 }
  0x16   : > { %s229_s15 = scalar_select %p228_p11, %s718_s21, 1  ;;  %579 = vmatpush3.bf16.msra.mxu1 %v578_v14 }
  0x17   : > { %580 = vmatprep.subr.bf16.mxu1 %v728_v3  ;;  %v330_v31 = vld [vmem:[#allocation2] sm:$0xff]  ;;  %s731_s21 = smov [#allocation3]  }
  0x18   : > { %s515_s16 = sshll.u32 %s229_s15, 3  ;;  %s652_s27 = sshll.u32 %s731_s21, 4  ;;  %s653_s27 = int_to_ptr.vmem [resolvable:$false] %s652_s27 }
  0x19   : > { %s231_s25 = scalar_lea.vmem %s920_s0, %s515_s16  ;;  %s654_s29 = scalar_lea.vmem %s653_s27, 256 }
  0x1a   : > { %v238_v8 = vld [vmem:[%s231_s25] sm:$0xff]  ;;  %582 = vmatpush3.bf16.msra.mxu1 %v581_v17  ;;  %s648_s25 = scalar_lea.vmem %s874_s14, 128  ;;  %p655_p1 = scmp.lt.s32.totalorder %s874_s14, %s653_s27 }
  0x1b   : > { %547 = vmatmul.mubr.msk.f32.vlgmr.msra.gmra.mrb[0].mxu0 %vm236_vm1, %v238_v8  ;;  %583 = vmatprep.subr.bf16.mxu1 %v728_v3  ;;  %p649_p12 = scmp.ne.s32.totalorder %s874_s14, %s648_s25  ;;  %p656_p2 = scmp.lt.s32.totalorder %s654_s29, %s648_s25 }
  0x1d   : > { %p650_p13 = pnand %p649_p12, %p802_p4  ;;  %p657_p3 = por %p656_p2, %p655_p1 }
  0x1e   : > { %585 = vmatpush3.bf16.msra.mxu1 %v584_v20 }
  0x1f   : > { %p651_p0 = pneg %p650_p13 }
  0x21   : > { %p658_p5 = pnand %p657_p3, %p651_p0 }
  0xee   : > { %v320_v22 = vpop.f32.mrb[0].mxu0 }
  0xef   : > { %v321_v23 = vadd.f32 %v516_v21, %v320_v22  ;;  %v548_v24 = vpop.f32.mrb[1].mxu0 }
  0xf1   : > { %v324_v25 = vmul.f32 -1.702, %v321_v23 }
  0xf3   : > { %v325_v26 = vmul.f32 1.442695, %v324_v25 }
  0xf5   : > { %644 = vpow2.f32 %v325_v26 }
  0xff   : > { %v645_v27 = vpop.eup %644 }
 0x100   : > { %v327_v28 = vadd.f32 1.0, %v645_v27 }
 0x102   : > { %646 = vrcp.f32 %v327_v28 }
 0x10c   : > { %v647_v29 = vpop.eup %646 }
 0x10d   : > { %v329_v30 = vmul.f32 %v647_v29, %v321_v23 }
 0x10f   : > { %566 = vmatmul.mubr.msk.f32.vlgmr.msra.gmra.mrb[0].mxu1 %vm339_vm2, %v329_v30 }
 0x1e2   : > { %v409_v32 = vpop.f32.mrb[0].mxu1 }
 0x1e3   : > { %v413_v33 = vadd.f32 %v409_v32, %v330_v31  ;;  %v567_v34 = vpop.f32.mrb[1].mxu1 }
 0x1e5   : > { %414 = vst.msk [vmem:[#allocation2] sm:$0xff] %vm236_vm1, %v413_v33 }
 0x1ec   : > { %v418_v36 = vld [vmem:[#allocation2] sm:$0xff] }
 0x1ed   : > { %v426_v37 = vadd.f32 %v519_v35, %v418_v36 }
 0x1ef   : > { %427 = vst.msk [vmem:[%s227_s13] sm:$0xff] %vm236_vm1, %v426_v37 }
 0x1f0   : > { %661 = shalt.err (!%p658_p5)
}
 0x1f1   : > { %s662_s7 = scalar_lea.hbm %s872_s17, 128  ;;  %s666_s10 = scalar_lea.hbm %s925_s5, 256 }
 0x1f2   : > { %p663_p6 = scmp.ne.s32.totalorder %s872_s17, %s662_s7  ;;  %p667_p10 = scmp.lt.u32.totalorder %s872_s17, %s925_s5 }
 0x1f3   : > { %p668_p11 = scmp.lt.u32.totalorder %s666_s10, %s662_s7  ;;  %p670_p13 = scmp.lt.u32.totalorder %s662_s7, %s872_s17 }
 0x1f4   : > { %p664_p7 = pnand %p663_p6, %p802_p4 }
 0x1f5   : > { %p669_p12 = por %p668_p11, %p667_p10 }
 0x1f6   : > { %p665_p9 = pneg %p664_p7 }
 0x1f7   : > { %p671_p0 = por %p670_p13, %p669_p12 }
 0x1f9   : > { %p672_p1 = pnand %p671_p0, %p665_p9 }
 0x1fb   : > { %675 = shalt.err (!%p672_p1)
}
 0x1fc   : > { %586 = dma.vmem_to_hbm [thread:$0]  (%p802_p4), %s874_s14, 128, %s872_s17, %s429_s24  }
 0x1fd PF: > { %p592_p2 = scmp.ge.s32.totalorder %s726_s23, 2  ;;  %s454_s13 = sand.u32 1, %s706_s18  }
 0x1fe   : > { %s455_s15 = scalar_lea.sflag [#allocation4], %s454_s13 }
 0x1ff   : > { %p589_p3 = pnand %p592_p2, %p809_p8 }
 0x201   : > { %701 = dma.done.wait (!%p589_p3), %s455_s15, 128  }
 0x202   : > { %703 = vsyncadd (!%p589_p3), %s455_s15, 4294967168  ;;  %s18_s23 = sadd.s32 1, %s726_s23   ;;  %s928_s18 = smov %s710_s19 }
 0x203   : > { %p15_p5 = scmp.ge.s32.totalorder %s18_s23, 4   ;;  %s929_s19 = smov %s714_s20 }
 0x204   : > { %s930_s20 = smov %s815_s6  ;;  %s931_s21 = smov %s722_s22 }
 0x205   : > { %s932_s22 = smov %s934_s26  ;;  %17 = sbr.rel (!%p15_p5) target bundleno = 4 (0x4), region = 83 }
 0x20c   :  { %460 = vsyncpa [#allocation4], 1 }
 0x20d   :  { %462 = vsyncpa [#allocation4 + $0x1], 1 }

</bundles_post_ra>
